<compile_context>
chip_gen: v7x
topology: tpu7x:2x2x1
jax: 0.10.0
libtpu: 0.0.40
codegen_flags: <defaults>
</compile_context>

<pallas_src>
import numpy as np
import jax
import jax.numpy as jnp
from jax import lax
from jax.experimental import pallas as pl
from jax.experimental.pallas import tpu as pltpu


# ----------------------------- problem sizes --------------------------------
B = 8        # batch
S = 16       # state dim
H = 32       # hidden dim of both sub-MLPs
A = 4        # action_shape
AA = A * A   # flat Cholesky width
NOUT = AA + A
ACTION_MAX = 1.0


def _split_flat_index(k):
    """(k // A, k % A) for an int32 iota tensor, vector-safe on TPU."""
    if (A & (A - 1)) == 0:                       # power of two: shift / mask
        return k >> (A.bit_length() - 1), k & (A - 1)
    return k // A, k % A                         # generic fallback


# ------------------------------ Pallas kernel -------------------------------
def qmodel_kernel(state_ref, action_ref, w1_ref, b1_ref, w2_ref, b2_ref, q_ref):
    st = state_ref[...]                                               # [TB, S]

    # ---- fused first layer of both sub-MLPs: [S, 2H] ----
    h = jnp.dot(st, w1_ref[...], preferred_element_type=jnp.float32) + b1_ref[...]
    h = jnp.maximum(h, 0.0)                                           # ReLU, [TB, 2H]

    # ---- fused second layer (block-diagonal): [2H, A*A + A] ----
    heads = jnp.dot(h, w2_ref[...], preferred_element_type=jnp.float32) + b2_ref[...]
    l_flat = heads[:, :AA]                                            # [TB, A*A]
    mu = jnp.tanh(heads[:, AA:NOUT]) * ACTION_MAX                     # [TB, A]

    # ---- tril / diag masking of flat L, generated in-kernel ----
    k = lax.broadcasted_iota(jnp.int32, (1, AA), 1)
    k_i, k_j = _split_flat_index(k)                                   # row/col of flat idx
    l_flat = jnp.where(k_i == k_j, jnp.exp(l_flat),
                       jnp.where(k_i > k_j, l_flat, 0.0))             # [TB, A*A]

    am = action_ref[...] - mu                                         # [TB, A]

    # ---- expansion matrices (in-kernel constants) ----
    # E1[r, k] = 1 if k // A == r   -> am @ E1 replicates am along flat rows
    rr = lax.broadcasted_iota(jnp.int32, (A, AA), 0)
    kk = lax.broadcasted_iota(jnp.int32, (A, AA), 1)
    kk_i, _ = _split_flat_index(kk)
    e1 = (kk_i == rr).astype(jnp.float32)                             # [A, A*A]
    # E2[k, c] = 1 if k % A == c    -> groups flat entries by column j
    kc = lax.broadcasted_iota(jnp.int32, (AA, A), 0)
    cc = lax.broadcasted_iota(jnp.int32, (AA, A), 1)
    _, kc_j = _split_flat_index(kc)
    e2 = (kc_j == cc).astype(jnp.float32)                             # [A*A, A]

    # y[b, j] = sum_i L[b, i, j] * am[b, i]  ==  (L^T am)
    am_exp = jnp.dot(am, e1, preferred_element_type=jnp.float32)      # [TB, A*A]
    y = jnp.dot(l_flat * am_exp, e2, preferred_element_type=jnp.float32)  # [TB, A]

    # 1/2 * am^T (L L^T) am = 1/2 * ||y||^2
    q_ref[...] = 0.5 * jnp.sum(y * y, axis=-1, keepdims=True)         # [TB, 1]


# ------------------------------ jitted wrapper -------------------------------
@jax.jit
def qmodel_forward(state, action, w1, b1, w2, b2):
    batch = state.shape[0]
    tb = batch if batch <= 256 else 256          # batch tile (full batch at small sizes)
    assert batch % tb == 0, "batch must be divisible by the batch tile"

    return pl.pallas_call(
        qmodel_kernel,
        out_shape=jax.ShapeDtypeStruct((batch, 1), jnp.float32),
        grid_spec=pltpu.PrefetchScalarGridSpec(
            num_scalar_prefetch=0,
            grid=(batch // tb,),
            in_specs=[
                pl.BlockSpec((tb, S), lambda b: (b, 0)),        # state
                pl.BlockSpec((tb, A), lambda b: (b, 0)),        # action
                pl.BlockSpec((S, 2 * H), lambda b: (0, 0)),     # fused W1 (resident)
                pl.BlockSpec((1, 2 * H), lambda b: (0, 0)),     # fused b1
                pl.BlockSpec((2 * H, NOUT), lambda b: (0, 0)),  # block-diag W2
                pl.BlockSpec((1, NOUT), lambda b: (0, 0)),      # fused b2
            ],
            out_specs=pl.BlockSpec((tb, 1), lambda b: (b, 0)),
        ),
        compiler_params=pltpu.CompilerParams(
            dimension_semantics=("parallel",)),
    )(state, action, w1, b1, w2, b2)


# -------------------------- parameter init & packing -------------------------
def init_params(key):
    def linear(key, fan_in, fan_out):
        kw, kb = jax.random.split(key)
        bound = 1.0 / np.sqrt(fan_in)
        w = jax.random.uniform(kw, (fan_in, fan_out), jnp.float32, -bound, bound)
        b = jax.random.uniform(kb, (1, fan_out), jnp.float32, -bound, bound)
        return w, b

    k = jax.random.split(key, 4)
    wp1, bp1 = linear(k[0], S, H)
    wp2, bp2 = linear(k[1], H, AA)
    wm1, bm1 = linear(k[2], S, H)
    wm2, bm2 = linear(k[3], H, A)
    return (wp1, bp1, wp2, bp2, wm1, bm1, wm2, bm2)


def pack_params(params):
    """One-time host-side fusion of the two sub-MLPs into 2 matmul layers."""
    wp1, bp1, wp2, bp2, wm1, bm1, wm2, bm2 = params
    w1 = jnp.concatenate([wp1, wm1], axis=1)                      # [S, 2H]
    b1 = jnp.concatenate([bp1, bm1], axis=1)                      # [1, 2H]
    w2 = jnp.block([[wp2, jnp.zeros((H, A), jnp.float32)],
                    [jnp.zeros((H, AA), jnp.float32), wm2]])      # [2H, A*A+A]
    b2 = jnp.concatenate([bp2, bm2], axis=1)                      # [1, A*A+A]
    return w1, b1, w2, b2


# --------------------------- pure-JAX reference ------------------------------
def qmodel_reference(state, action, params):
    (wp1, bp1, wp2, bp2, wm1, bm1, wm2, bm2) = params
    h_p = jnp.maximum(state @ wp1 + bp1, 0.0)
    l_flat = h_p @ wp2 + bp2
    L = l_flat.reshape(-1, A, A)
    tril = jnp.tril(jnp.ones((A, A)), k=-1)[None]
    diag = jnp.eye(A)[None]
    L = L * tril + jnp.exp(L) * diag
    P = jnp.einsum('bij,bkj->bik', L, L)                 # L @ L^T
    h_m = jnp.maximum(state @ wm1 + bm1, 0.0)
    mu = jnp.tanh(h_m @ wm2 + bm2) * ACTION_MAX
    am = (action - mu)[:, :, None]
    Aval = jnp.einsum('bi1,bij,bj1->b1', am, P, am)
    return 0.5 * Aval


if __name__ == "__main__":
    key = jax.random.PRNGKey(0)
    k_state, k_action, k_params = jax.random.split(key, 3)

    state = jax.random.normal(k_state, (B, S), jnp.float32)
    action = jax.random.uniform(k_action, (B, A), jnp.float32, -1.0, 1.0)
    params = init_params(k_params)
    packed = pack_params(params)          # packed once, outside the jitted forward

    q = qmodel_forward(state, action, *packed)
    q = jax.block_until_ready(q)

    q_ref = qmodel_reference(state, action, params)
    np.testing.assert_allclose(np.asarray(q), np.asarray(q_ref), rtol=1e-5, atol=1e-5)

    print("KERNEL_OK")
</pallas_src>

<mosaic_0001>
module attributes {stable_mosaic.version = 11 : i64} {
  func.func @qmodel_kernel(%arg0: i32, %arg1: memref<8x16xf32, #tpu.memory_space<vmem>>, %arg2: memref<8x4xf32, #tpu.memory_space<vmem>>, %arg3: memref<16x64xf32, #tpu.memory_space<vmem>>, %arg4: memref<1x64xf32, #tpu.memory_space<vmem>>, %arg5: memref<64x20xf32, #tpu.memory_space<vmem>>, %arg6: memref<1x20xf32, #tpu.memory_space<vmem>>, %arg7: memref<8x1xf32, #tpu.memory_space<vmem>>) attributes {dimension_semantics = [#tpu.dimension_semantics<parallel>], iteration_bounds = array<i64: 1>, scalar_prefetch = 0 : i64, scratch_operands = 0 : i64, tpu.core_type = #tpu.core_type<tc>, window_params = [{transform_indices = @transform_0, window_bounds = array<i64: 8, 16>}, {transform_indices = @transform_1, window_bounds = array<i64: 8, 4>}, {pipeline_mode = #tpu.pipeline_mode<synchronous>, transform_indices = @transform_2, window_bounds = array<i64: 16, 64>}, {pipeline_mode = #tpu.pipeline_mode<synchronous>, transform_indices = @transform_3, window_bounds = array<i64: 1, 64>}, {pipeline_mode = #tpu.pipeline_mode<synchronous>, transform_indices = @transform_4, window_bounds = array<i64: 64, 20>}, {pipeline_mode = #tpu.pipeline_mode<synchronous>, transform_indices = @transform_5, window_bounds = array<i64: 1, 20>}, {transform_indices = @transform_6, window_bounds = array<i64: 8, 1>}]} {
    %c0 = arith.constant 0 : index
    %c0_0 = arith.constant 0 : index
    %0 = vector.load %arg1[%c0, %c0_0] : memref<8x16xf32, #tpu.memory_space<vmem>>, vector<8x16xf32>
    %c0_1 = arith.constant 0 : index
    %c0_2 = arith.constant 0 : index
    %1 = vector.load %arg3[%c0_1, %c0_2] : memref<16x64xf32, #tpu.memory_space<vmem>>, vector<16x64xf32>
    %cst = arith.constant dense<0.000000e+00> : vector<8x64xf32>
    %2 = tpu.matmul %0, %1, %cst {dimension_numbers = #tpu.dot_dimension_numbers<[1], [0], [0], [1], [0, 0, 1, 1], [], []>} : vector<8x16xf32>, vector<16x64xf32>, vector<8x64xf32> -> vector<8x64xf32>
    %c0_3 = arith.constant 0 : index
    %c0_4 = arith.constant 0 : index
    %3 = vector.load %arg4[%c0_3, %c0_4] : memref<1x64xf32, #tpu.memory_space<vmem>>, vector<1x64xf32>
    %4 = vector.broadcast %3 : vector<1x64xf32> to vector<8x64xf32>
    %5 = arith.addf %2, %4 : vector<8x64xf32>
    %cst_5 = arith.constant 0.000000e+00 : f32
    %6 = vector.broadcast %cst_5 : f32 to vector<8x64xf32>
    %7 = arith.maximumf %5, %6 : vector<8x64xf32>
    %c0_6 = arith.constant 0 : index
    %c0_7 = arith.constant 0 : index
    %8 = vector.load %arg5[%c0_6, %c0_7] : memref<64x20xf32, #tpu.memory_space<vmem>>, vector<64x20xf32>
    %cst_8 = arith.constant dense<0.000000e+00> : vector<8x20xf32>
    %9 = tpu.matmul %7, %8, %cst_8 {dimension_numbers = #tpu.dot_dimension_numbers<[1], [0], [0], [1], [0, 0, 1, 1], [], []>} : vector<8x64xf32>, vector<64x20xf32>, vector<8x20xf32> -> vector<8x20xf32>
    %c0_9 = arith.constant 0 : index
    %c0_10 = arith.constant 0 : index
    %10 = vector.load %arg6[%c0_9, %c0_10] : memref<1x20xf32, #tpu.memory_space<vmem>>, vector<1x20xf32>
    %11 = vector.broadcast %10 : vector<1x20xf32> to vector<8x20xf32>
    %12 = arith.addf %9, %11 : vector<8x20xf32>
    %13 = vector.extract_strided_slice %12 {offsets = [0, 0], sizes = [8, 16], strides = [1, 1]} : vector<8x20xf32> to vector<8x16xf32>
    %14 = vector.extract_strided_slice %12 {offsets = [0, 16], sizes = [8, 4], strides = [1, 1]} : vector<8x20xf32> to vector<8x4xf32>
    %15 = math.tanh %14 : vector<8x4xf32>
    %cst_11 = arith.constant 1.000000e+00 : f32
    %16 = vector.broadcast %cst_11 : f32 to vector<8x4xf32>
    %17 = arith.mulf %15, %16 : vector<8x4xf32>
    %18 = tpu.iota {dimensions = array<i32: 1>} : vector<1x16xi32>
    %c2_i32 = arith.constant 2 : i32
    %19 = vector.broadcast %c2_i32 : i32 to vector<1x16xi32>
    %20 = arith.shrsi %18, %19 : vector<1x16xi32>
    %c3_i32 = arith.constant 3 : i32
    %21 = vector.broadcast %c3_i32 : i32 to vector<1x16xi32>
    %22 = arith.andi %18, %21 : vector<1x16xi32>
    %23 = arith.cmpi eq, %20, %22 : vector<1x16xi32>
    %24 = math.exp %13 : vector<8x16xf32>
    %25 = arith.cmpi sgt, %20, %22 : vector<1x16xi32>
    %cst_12 = arith.constant 0.000000e+00 : f32
    %26 = vector.shape_cast %25 : vector<1x16xi1> to vector<1x16xi1>
    %27 = vector.broadcast %26 : vector<1x16xi1> to vector<8x16xi1>
    %28 = vector.broadcast %cst_12 : f32 to vector<8x16xf32>
    %29 = arith.select %27, %13, %28 : vector<8x16xi1>, vector<8x16xf32>
    %30 = vector.shape_cast %23 : vector<1x16xi1> to vector<1x16xi1>
    %31 = vector.broadcast %30 : vector<1x16xi1> to vector<8x16xi1>
    %32 = arith.select %31, %24, %29 : vector<8x16xi1>, vector<8x16xf32>
    %c0_13 = arith.constant 0 : index
    %c0_14 = arith.constant 0 : index
    %33 = vector.load %arg2[%c0_13, %c0_14] : memref<8x4xf32, #tpu.memory_space<vmem>>, vector<8x4xf32>
    %34 = arith.subf %33, %17 : vector<8x4xf32>
    %35 = tpu.iota {dimensions = array<i32: 0>} : vector<4x16xi32>
    %36 = tpu.iota {dimensions = array<i32: 1>} : vector<4x16xi32>
    %c2_i32_15 = arith.constant 2 : i32
    %37 = vector.broadcast %c2_i32_15 : i32 to vector<4x16xi32>
    %38 = arith.shrsi %36, %37 : vector<4x16xi32>
    %39 = arith.cmpi eq, %38, %35 : vector<4x16xi32>
    %40 = arith.extui %39 : vector<4x16xi1> to vector<4x16xi32>
    %41 = arith.sitofp %40 : vector<4x16xi32> to vector<4x16xf32>
    %42 = tpu.iota {dimensions = array<i32: 0>} : vector<16x4xi32>
    %43 = tpu.iota {dimensions = array<i32: 1>} : vector<16x4xi32>
    %c3_i32_16 = arith.constant 3 : i32
    %44 = vector.broadcast %c3_i32_16 : i32 to vector<16x4xi32>
    %45 = arith.andi %42, %44 : vector<16x4xi32>
    %46 = arith.cmpi eq, %45, %43 : vector<16x4xi32>
    %47 = arith.extui %46 : vector<16x4xi1> to vector<16x4xi32>
    %48 = arith.sitofp %47 : vector<16x4xi32> to vector<16x4xf32>
    %cst_17 = arith.constant dense<0.000000e+00> : vector<8x16xf32>
    %49 = tpu.matmul %34, %41, %cst_17 {dimension_numbers = #tpu.dot_dimension_numbers<[1], [0], [0], [1], [0, 0, 1, 1], [], []>} : vector<8x4xf32>, vector<4x16xf32>, vector<8x16xf32> -> vector<8x16xf32>
    %50 = arith.mulf %32, %49 : vector<8x16xf32>
    %cst_18 = arith.constant dense<0.000000e+00> : vector<8x4xf32>
    %51 = tpu.matmul %50, %48, %cst_18 {dimension_numbers = #tpu.dot_dimension_numbers<[1], [0], [0], [1], [0, 0, 1, 1], [], []>} : vector<8x16xf32>, vector<16x4xf32>, vector<8x4xf32> -> vector<8x4xf32>
    %52 = arith.mulf %51, %51 : vector<8x4xf32>
    %cst_19 = arith.constant dense<0.000000e+00> : vector<8xf32>
    %53 = vector.multi_reduction <add>, %52, %cst_19 [1] : vector<8x4xf32> to vector<8xf32>
    %54 = vector.shape_cast %53 : vector<8xf32> to vector<8x1xf32>
    %cst_20 = arith.constant 5.000000e-01 : f32
    %55 = vector.broadcast %cst_20 : f32 to vector<8x1xf32>
    %56 = arith.mulf %55, %54 : vector<8x1xf32>
    %c0_21 = arith.constant 0 : index
    %c0_22 = arith.constant 0 : index
    %57 = vector.load %arg7[%c0_21, %c0_22] : memref<8x1xf32, #tpu.memory_space<vmem>>, vector<8x1xf32>
    tpu.vector_store %arg7[%c0_21, %c0_22], %56 {strides = array<i32>} : memref<8x1xf32, #tpu.memory_space<vmem>>, vector<8x1xf32>,
    return
  }
  func.func @transform_0(%arg0: i32) -> (i32, i32) {
    %c0_i32 = arith.constant 0 : i32
    %c0_i32_0 = arith.constant 0 : i32
    return %arg0, %c0_i32 : i32, i32
  }
  func.func @transform_1(%arg0: i32) -> (i32, i32) {
    %c0_i32 = arith.constant 0 : i32
    %c0_i32_0 = arith.constant 0 : i32
    return %arg0, %c0_i32 : i32, i32
  }
  func.func @transform_2(%arg0: i32) -> (i32, i32) {
    %c0_i32 = arith.constant 0 : i32
    %c0_i32_0 = arith.constant 0 : i32
    %c0_i32_1 = arith.constant 0 : i32
    return %c0_i32, %c0_i32_0 : i32, i32
  }
  func.func @transform_3(%arg0: i32) -> (i32, i32) {
    %c0_i32 = arith.constant 0 : i32
    %c0_i32_0 = arith.constant 0 : i32
    %c0_i32_1 = arith.constant 0 : i32
    return %c0_i32, %c0_i32_0 : i32, i32
  }
  func.func @transform_4(%arg0: i32) -> (i32, i32) {
    %c0_i32 = arith.constant 0 : i32
    %c0_i32_0 = arith.constant 0 : i32
    %c0_i32_1 = arith.constant 0 : i32
    return %c0_i32, %c0_i32_0 : i32, i32
  }
  func.func @transform_5(%arg0: i32) -> (i32, i32) {
    %c0_i32 = arith.constant 0 : i32
    %c0_i32_0 = arith.constant 0 : i32
    %c0_i32_1 = arith.constant 0 : i32
    return %c0_i32, %c0_i32_0 : i32, i32
  }
  func.func @transform_6(%arg0: i32) -> (i32, i32) {
    %c0_i32 = arith.constant 0 : i32
    %c0_i32_0 = arith.constant 0 : i32
    return %arg0, %c0_i32 : i32, i32
  }
}

</mosaic_0001>

<bundles_post_ra>
// kernel: qmodel_forward.1
= control target key start
LH: loop header
LB: loop body
LE: loop exit
PB: predicated region body
PF: predicated region fallthrough
CT: control target
= control target key end

     0   :  { %v489_v0 = vmov 0.0|0.0   ;;  %vm490_vm0 = vmmov 0   ;;  %v491_v3 = vmov 0.0   ;;  %vm33_vm1 = vcmask 130048   ;;  %s586_s2 = inlined_call_operand.vmem [shape: f32[16,64], index: 2, kind: input, shape index: {}]   ;;  %s587_s4 = inlined_call_operand.vmem [shape: f32[64,20], index: 4, kind: input, shape index: {}]   ;;  %s588_s0 = inlined_call_operand.vmem [shape: f32[8,16], index: 0, kind: input, shape index: {}]   ;;  %s589_s3 = inlined_call_operand.vmem [shape: f32[1,64], index: 3, kind: input, shape index: {}]   ;;  %s590_s5 = inlined_call_operand.vmem [shape: f32[1,20], index: 5, kind: input, shape index: {}]   ;;  %s591_s1 = inlined_call_operand.vmem [shape: f32[8,4], index: 1, kind: input, shape index: {}]   ;;  %s592_s6 = inlined_call_operand.vmem [shape: f32[8,1], index: 6, kind: output, shape index: {}]  }
   0x1   :  { %462 = vmatprep.subr.bf16.mxu0 %v489_v0  ;;  %v24_v1 = vld [vmem:[%s586_s2] sm:$0xff]  ;;  %v25_v2 = vld [vmem:[%s586_s2 + $0x8] sm:$0xff]  ;;  %428 = vmatprep.mubr.msk.f32.mxu0 %vm490_vm0, %v491_v3  ;;  %v110_v7 = vld [vmem:[%s587_s4 + $0x10] sm:$0xff]  ;;  %vm123_vm2 = vcmask 523264   ;;  %v198_v23 = vlaneseq  ;;  %vm236_vm3 = vcmask 1043456   ;;  %vm232_vm9 = vcmask 31744  }
   0x2   :  { %v463_v4 = vpack.c.bf16 %v25_v2, %v24_v1  ;;  %465 = vmatprep.subr.bf16.mxu1 %v489_v0  ;;  %v108_v5 = vld [vmem:[%s587_s4] sm:$0xff]  ;;  %v109_v6 = vld [vmem:[%s587_s4 + $0x8] sm:$0xff]  ;;  %447 = vmatprep.mubr.msk.f32.mxu1 %vm490_vm0, %v491_v3  ;;  %v111_v9 = vld [vmem:[%s587_s4 + $0x18] sm:$0xff]  ;;  %v493_v44 = vmov 1.0|1.0   ;;  %vm389_vm11 = vcmask 7168  }
   0x3   :  { %v466_v8 = vpack.c.bf16 %v109_v6, %v108_v5  ;;  %v23_v10 = vld [vmem:[%s588_s0] sm:$0xff]  ;;  %v469_v11 = vpack.c.bf16 %v111_v9, %v110_v7  ;;  %v113_v13 = vld [vmem:[%s587_s4 + $0x28] sm:$0xff]  ;;  %v114_v15 = vld [vmem:[%s587_s4 + $0x30] sm:$0xff]  ;;  %v199_v24 = vand.u32 127, %v198_v23  ;;  %v219_v26 = vshrl.u32 %v198_v23, 7 }
   0x4   :  { %464 = vmatpush3.bf16.msra.mxu0 %v463_v4  ;;  %v112_v12 = vld [vmem:[%s587_s4 + $0x20] sm:$0xff]  ;;  %v115_v16 = vld [vmem:[%s587_s4 + $0x38] sm:$0xff] }
   0x5   :  { %467 = vmatpush3.bf16.msra.mxu1 %v466_v8  ;;  %450 = vmatprep.subr.mxu0 %v491_v3  ;;  %v472_v14 = vpack.c.bf16 %v113_v13, %v112_v12  ;;  %v475_v17 = vpack.c.bf16 %v115_v16, %v114_v15  ;;  %v395_v18 = vld [vmem:[%s589_s3] ss:$0 sm:$0xff]  ;;  %v200_v25 = vshra.s32 %v199_v24, 2  ;;  %v201_v28 = vand.u32 3, %v199_v24  ;;  %s492_s3 = smov 112  }
   0x6   :  { %468 = vmatprep.subr.bf16.mxu1 %v489_v0  ;;  %v397_v29 = vld [vmem:[%s590_s5] ss:$0 sm:$0xff]  ;;  %v223_v38 = vadd.s32 8, %v219_v26  ;;  %v224_v39 = vand.u32 3, %v219_v26 }
   0x7   :  { %429 = vmatmul.mubr.msk.f32.vlgmr.msra.gmra.mrb[0].mxu0 %vm33_vm1, %v23_v10  ;;  %vm220_vm4 = vcmp.eq.s32.totalorder %v200_v25, %v219_v26  ;;  %vm205_vm5 = vcmp.gt.s32.totalorder %v200_v25, %v201_v28  ;;  %vm202_vm6 = vcmp.eq.s32.totalorder %v200_v25, %v201_v28  ;;  %v212_v41 = vld [vmem:[%s591_s1] sm:$0xff] }
   0x8   :  { %452 = vmatprep.mubr.msk.f32.mxu0 %vm490_vm0, %v491_v3  ;;  %v399_v27 = vsel %vm220_vm4, 1.0, %v491_v3  ;;  %v225_v40 = vand.u32 3, %v223_v38  ;;  %vm226_vm7 = vcmp.eq.s32.totalorder %v224_v39, %v199_v24 }
   0x9   :  { %470 = vmatpush3.bf16.msra.mxu1 %v469_v11  ;;  %451 = vmatpush3.msk.msra.mxu0 %vm236_vm3, %v399_v27 }
   0xa   :  { %471 = vmatprep.subr.bf16.mxu1 %v489_v0  ;;  %477 = vmatprep.subr.bf16.mxu0 %v489_v0  ;;  %vm227_vm8 = vcmp.eq.s32.totalorder %v225_v40, %v199_v24 }
   0xb   :  { %vm478_vm10 = vmpackc.low %vm227_vm8, %vm226_vm7 }
   0xd   :  { %473 = vmatpush3.bf16.msra.mxu1 %v472_v14 }
   0xe   :  { %474 = vmatprep.subr.bf16.mxu1 %v489_v0 }
  0x11   :  { %476 = vmatpush3.bf16.msra.mxu1 %v475_v17 }
  0xda   :  { %v103_v19 = vpop.f32.mrb[0].mxu0 }
  0xdb   :  { %v104_v20 = vadd.f32 %v395_v18, %v103_v19  ;;  %v430_v21 = vpop.f32.mrb[1].mxu0 }
  0xdd   :  { %v107_v22 = vmax.f32 %v104_v20, 0.0 }
  0xdf   :  { %448 = vmatmul.mubr.msk.f32.vlgmr.msra.gmra.mrb[0].mxu1 %vm123_vm2, %v107_v22 }
 0x1b2   :  { %v193_v30 = vpop.f32.mrb[0].mxu1 }
 0x1b3   :  { %v194_v31 = vadd.f32 %v397_v29, %v193_v30  ;;  %v449_v32 = vpop.f32.mrb[1].mxu1 }
 0x1b5   :  { %485 = vtanh.f32 %v194_v31  ;;  %v203_v33 = vmul.f32 1.442695, %v194_v31  ;;  %v208_v34 = vsel %vm205_vm5, %v194_v31, 0.0 }
 0x1b7   :  { %487 = vpow2.f32 %v203_v33 }
 0x1bf   :  { %v486_v35 = vpop.eup %485 }
 0x1c0   :  { %214 = vrot.lane.b32.xlu0 %v486_v35, %s492_s3 }
 0x1c1   :  { %v488_v36 = vpop.eup %487 }
 0x1c2   :  { %v211_v37 = vsel %vm202_vm6, %v488_v36, %v208_v34 }
 0x232   :  { %v215_v42 = vpop.permute.xlu0 %214 }
 0x233   :  { %v217_v43 = vsub.f32 %v212_v41, %v215_v42 }
 0x235   :  { %453 = vmatmul.mubr.msk.f32.vlgmr.msra.gmra.mrb[2].mxu0 %vm232_vm9, %v217_v43 }
 0x236   :  { %479 = vmatpush3.bf16.msk.msra.mxu0 %vm478_vm10, %v493_v44  ;;  %459 = vmatprep.mubr.msk.f32.mxu0 %vm490_vm0, %v491_v3 }
 0x308   :  { %v306_v45 = vpop.f32.mrb[2].mxu0 }
 0x309   :  { %v310_v46 = vmul.f32 %v306_v45, %v211_v37  ;;  %v454_v47 = vpop.f32.mrb[3].mxu0 }
 0x30b   :  { %460 = vmatmul.mubr.msk.f32.vlgmr.msra.gmra.mrb[4].mxu0 %vm33_vm1, %v310_v46 }
 0x3de   :  { %v380_v48 = vpop.f32.mrb[4].mxu0 }
 0x3df   :  { %v384_v49 = vmul.f32 %v380_v48, %v380_v48  ;;  %v461_v50 = vpop.f32.mrb[5].mxu0 }
 0x3e1   :  { %v385_v51 = vsel %vm232_vm9, %v384_v49, 0.0 }
 0x3e2   :  { %386 = vadd.xlane.f32.xlu0 %v385_v51 }
 0x46f   :  { %v387_v52 = vpop.xlane.xlu0 %386 }
 0x470   :  { %v388_v53 = vmul.f32 0.5, %v387_v52 }
 0x472   :  { %390 = vst.msk [vmem:[%s592_s6] sm:$0xff] %vm389_vm11, %v388_v53 }

</bundles_post_ra>
